<compile_context>
chip_gen: v7x
topology: tpu7x:2x2x1
jax: 0.10.0
libtpu: 0.0.40
codegen_flags: <defaults>
</compile_context>

<pallas_src>
import functools

import jax
import jax.numpy as jnp
from jax.experimental import pallas as pl
from jax.experimental.pallas import tpu as pltpu


def _round_up(n, m):
    return ((n + m - 1) // m) * m


# ---------------------------------------------------------------------------
# Kernels: batch rides the sublane dim, features ride lanes.
# ---------------------------------------------------------------------------
def _packed_kernel(x_ref, w1_ref, b1_ref, w2_ref, b2_ref, o_ref, *, emb):
    # x_ref:  (tb, in_dim)  f32   streamed batch tile
    # w1_ref: (in_dim, 128) bf16  [user L1 | item L1] packed into one group
    # b1_ref: (1, 128)      f32
    # w2_ref: (128, 128)    bf16  block-diagonal [user L2 ; item L2]
    # b2_ref: (1, 128)      f32
    # o_ref:  (tb, 1)       f32   similarity column
    x = x_ref[...].astype(w1_ref.dtype)                 # bf16 cast on-chip
    h = jnp.dot(x, w1_ref[...], preferred_element_type=jnp.float32)
    h = jnp.maximum(h + b1_ref[...], 0.0)               # bias + ReLU in f32
    h = h.astype(w2_ref.dtype)
    e = jnp.dot(h, w2_ref[...], preferred_element_type=jnp.float32)
    e = e + b2_ref[...]
    u = e[:, :emb]                                      # user embedding
    it = e[:, emb:2 * emb]                              # item embedding
    sim = jnp.sum(u * it, axis=-1, keepdims=True)       # (tb, 1)
    o_ref[...] = 1.0 / (1.0 + jnp.exp(-sim))            # sigmoid (EUP exp)


def _split_kernel(x_ref, w1_ref, b1_ref, wu2_ref, wi2_ref, bu2_ref, bi2_ref,
                  o_ref, *, hid_p):
    # General path for large towers: layer 2 as two dense per-tower matmuls
    # (tile-aligned slices of h), so no zero-block MXU work.
    x = x_ref[...].astype(w1_ref.dtype)
    h = jnp.dot(x, w1_ref[...], preferred_element_type=jnp.float32)
    h = jnp.maximum(h + b1_ref[...], 0.0)
    h = h.astype(wu2_ref.dtype)
    hu = h[:, :hid_p]
    hi = h[:, hid_p:]
    u = jnp.dot(hu, wu2_ref[...], preferred_element_type=jnp.float32) + bu2_ref[...]
    it = jnp.dot(hi, wi2_ref[...], preferred_element_type=jnp.float32) + bi2_ref[...]
    sim = jnp.sum(u * it, axis=-1, keepdims=True)
    o_ref[...] = 1.0 / (1.0 + jnp.exp(-sim))


# ---------------------------------------------------------------------------
# Parameter packing
# ---------------------------------------------------------------------------
def pack_params(params, compute_dtype=jnp.bfloat16):
    """Pack both towers' weights; zero padding contributes exactly 0."""
    wu1, bu1, wu2, bu2, wi1, bi1, wi2, bi2 = params
    in_dim, hid = wu1.shape
    emb = wu2.shape[1]
    packed = (2 * hid <= 128) and (2 * emb <= 128)

    if packed:
        HP, EP = 128, 128
        w1 = jnp.zeros((in_dim, HP), jnp.float32)
        w1 = w1.at[:, :hid].set(wu1).at[:, hid:2 * hid].set(wi1)
        b1 = jnp.zeros((1, HP), jnp.float32)
        b1 = b1.at[0, :hid].set(bu1.reshape(-1)).at[0, hid:2 * hid].set(bi1.reshape(-1))
        w2 = jnp.zeros((HP, EP), jnp.float32)
        w2 = w2.at[:hid, :emb].set(wu2).at[hid:2 * hid, emb:2 * emb].set(wi2)
        b2 = jnp.zeros((1, EP), jnp.float32)
        b2 = b2.at[0, :emb].set(bu2.reshape(-1)).at[0, emb:2 * emb].set(bi2.reshape(-1))
        ws = (w1.astype(compute_dtype), b1, w2.astype(compute_dtype), b2)
        dims = dict(in_dim=in_dim, hid=hid, emb=emb, packed=True)
    else:
        hid_p = _round_up(hid, 128)
        emb_p = _round_up(emb, 128)
        w1 = jnp.zeros((in_dim, 2 * hid_p), jnp.float32)
        w1 = w1.at[:, :hid].set(wu1).at[:, hid_p:hid_p + hid].set(wi1)
        b1 = jnp.zeros((1, 2 * hid_p), jnp.float32)
        b1 = b1.at[0, :hid].set(bu1.reshape(-1)).at[0, hid_p:hid_p + hid].set(bi1.reshape(-1))
        wu2p = jnp.zeros((hid_p, emb_p), jnp.float32).at[:hid, :emb].set(wu2)
        wi2p = jnp.zeros((hid_p, emb_p), jnp.float32).at[:hid, :emb].set(wi2)
        bu2p = jnp.zeros((1, emb_p), jnp.float32).at[0, :emb].set(bu2.reshape(-1))
        bi2p = jnp.zeros((1, emb_p), jnp.float32).at[0, :emb].set(bi2.reshape(-1))
        ws = (w1.astype(compute_dtype), b1, wu2p.astype(compute_dtype),
              wi2p.astype(compute_dtype), bu2p, bi2p)
        dims = dict(in_dim=in_dim, hid=hid, emb=emb, packed=False, hid_p=hid_p,
                    emb_p=emb_p)
    return ws, dims


def _vmem_limit_bytes():
    """Generation-aware VMEM budget: half of physical capacity, capped."""
    try:
        cap = pltpu.get_tpu_info().vmem_capacity_bytes
    except Exception:
        cap = 64 * 1024 * 1024
    return int(min(cap // 2, 100 * 1024 * 1024))


# ---------------------------------------------------------------------------
# Wrapper
# ---------------------------------------------------------------------------
def two_tower_retrieval(x, params, *, compute_dtype=jnp.bfloat16, tb=None):
    ws, d = pack_params(params, compute_dtype)
    B, in_dim = x.shape
    assert in_dim == d["in_dim"]

    # Batch tile: sublane-aligned, big enough to amortize the per-step
    # overhead but with >= 2 grid steps when possible (v7x dual TensorCore).
    if tb is None:
        if B >= 2048:
            tb = 1024
        elif B >= 16:
            tb = _round_up((B + 1) // 2, 8)
        else:
            tb = _round_up(max(B, 1), 8)
    grid = (pl.cdiv(B, tb),)

    x_spec = pl.BlockSpec((tb, in_dim), lambda i: (i, 0))        # streamed tile
    weight_specs = [pl.BlockSpec(w.shape, lambda i: (0, 0)) for w in ws]
    out_spec = pl.BlockSpec((tb, 1), lambda i: (i, 0))           # sim column

    if d["packed"]:
        kernel = functools.partial(_packed_kernel, emb=d["emb"])
        l2_flops = ws[2].shape[0] * ws[2].shape[1]               # block-diag w2
    else:
        kernel = functools.partial(_split_kernel, hid_p=d["hid_p"])
        l2_flops = 2 * ws[2].shape[0] * ws[2].shape[1]           # two dense w2

    weight_bytes = sum(int(w.size) * w.dtype.itemsize for w in ws)
    cost = pl.CostEstimate(
        flops=int(2 * B * (ws[0].shape[0] * ws[0].shape[1] + l2_flops)),
        transcendentals=int(B),
        bytes_accessed=int(B * in_dim * x.dtype.itemsize + weight_bytes + B * 4),
    )

    out = pl.pallas_call(
        kernel,
        out_shape=jax.ShapeDtypeStruct((B, 1), jnp.float32),
        grid=grid,
        in_specs=[x_spec] + weight_specs,
        out_specs=out_spec,
        compiler_params=pltpu.CompilerParams(
            dimension_semantics=("parallel",),
            vmem_limit_bytes=_vmem_limit_bytes(),
        ),
        cost_estimate=cost,
    )(x, *ws)

    return out


# ---------------------------------------------------------------------------
# Init + pure-JAX reference
# ---------------------------------------------------------------------------
def init_params(key, in_dim, hid_dim, emb_dim):
    ks = jax.random.split(key, 8)
    s1 = 1.0 / jnp.sqrt(in_dim)
    s2 = 1.0 / jnp.sqrt(hid_dim)
    wu1 = jax.random.uniform(ks[0], (in_dim, hid_dim), jnp.float32, -s1, s1)
    bu1 = jax.random.uniform(ks[1], (1, hid_dim), jnp.float32, -s1, s1)
    wu2 = jax.random.uniform(ks[2], (hid_dim, emb_dim), jnp.float32, -s2, s2)
    bu2 = jax.random.uniform(ks[3], (1, emb_dim), jnp.float32, -s2, s2)
    wi1 = jax.random.uniform(ks[4], (in_dim, hid_dim), jnp.float32, -s1, s1)
    bi1 = jax.random.uniform(ks[5], (1, hid_dim), jnp.float32, -s1, s1)
    wi2 = jax.random.uniform(ks[6], (hid_dim, emb_dim), jnp.float32, -s2, s2)
    bi2 = jax.random.uniform(ks[7], (1, emb_dim), jnp.float32, -s2, s2)
    return (wu1, bu1, wu2, bu2, wi1, bi1, wi2, bi2)


def reference(x, params, compute_dtype=jnp.bfloat16):
    """Pure-JAX reference with the same bf16 quantization of matmul operands
    (f32 accumulation / elementwise) as the kernel."""
    wu1, bu1, wu2, bu2, wi1, bi1, wi2, bi2 = params
    f32 = jnp.float32
    q = lambda a: a.astype(compute_dtype).astype(f32)
    xq = q(x)
    u = jnp.maximum(xq @ q(wu1) + bu1, 0.0)
    u = q(u) @ q(wu2) + bu2
    it = jnp.maximum(xq @ q(wi1) + bi1, 0.0)
    it = q(it) @ q(wi2) + bi2
    sim = jnp.sum(u * it, axis=-1, keepdims=True)
    return 1.0 / (1.0 + jnp.exp(-sim))


if __name__ == "__main__":
    key = jax.random.PRNGKey(0)
    kx, kp = jax.random.split(key)

    batch, in_dim, hid_dim, emb_dim = 8, 32, 32, 16
    x = jax.random.normal(kx, (batch, in_dim), jnp.float32)
    params = init_params(kp, in_dim, hid_dim, emb_dim)

    out = two_tower_retrieval(x, params)
    out = jax.block_until_ready(out)

    ref = reference(x, params)
    assert out.shape == (batch, 1), out.shape
    assert jnp.allclose(out, ref, atol=2e-4, rtol=2e-4), (out, ref)

    print("KERNEL_OK")
</pallas_src>

<mosaic_0001>
module attributes {stable_mosaic.version = 11 : i64} {
  func.func @_packed_kernel(%arg0: i32, %arg1: memref<8x32xf32, #tpu.memory_space<vmem>>, %arg2: memref<32x128xbf16, #tpu.memory_space<vmem>>, %arg3: memref<1x128xf32, #tpu.memory_space<vmem>>, %arg4: memref<128x128xbf16, #tpu.memory_space<vmem>>, %arg5: memref<1x128xf32, #tpu.memory_space<vmem>>, %arg6: memref<8x1xf32, #tpu.memory_space<vmem>>) attributes {dimension_semantics = [#tpu.dimension_semantics<parallel>], iteration_bounds = array<i64: 1>, scalar_prefetch = 0 : i64, scratch_operands = 0 : i64, tpu.core_type = #tpu.core_type<tc>, window_params = [{transform_indices = @transform_0, window_bounds = array<i64: 8, 32>}, {pipeline_mode = #tpu.pipeline_mode<synchronous>, transform_indices = @transform_1, window_bounds = array<i64: 32, 128>}, {pipeline_mode = #tpu.pipeline_mode<synchronous>, transform_indices = @transform_2, window_bounds = array<i64: 1, 128>}, {pipeline_mode = #tpu.pipeline_mode<synchronous>, transform_indices = @transform_3, window_bounds = array<i64: 128, 128>}, {pipeline_mode = #tpu.pipeline_mode<synchronous>, transform_indices = @transform_4, window_bounds = array<i64: 1, 128>}, {transform_indices = @transform_5, window_bounds = array<i64: 8, 1>}]} {
    %c0 = arith.constant 0 : index
    %c0_0 = arith.constant 0 : index
    %0 = vector.load %arg1[%c0, %c0_0] : memref<8x32xf32, #tpu.memory_space<vmem>>, vector<8x32xf32>
    %1 = arith.truncf %0 : vector<8x32xf32> to vector<8x32xbf16>
    %c0_1 = arith.constant 0 : index
    %c0_2 = arith.constant 0 : index
    %2 = vector.load %arg2[%c0_1, %c0_2] : memref<32x128xbf16, #tpu.memory_space<vmem>>, vector<32x128xbf16>
    %cst = arith.constant dense<0.000000e+00> : vector<8x128xf32>
    %3 = tpu.matmul %1, %2, %cst {dimension_numbers = #tpu.dot_dimension_numbers<[1], [0], [0], [1], [0, 0, 1, 1], [], []>} : vector<8x32xbf16>, vector<32x128xbf16>, vector<8x128xf32> -> vector<8x128xf32>
    %c0_3 = arith.constant 0 : index
    %c0_4 = arith.constant 0 : index
    %4 = vector.load %arg3[%c0_3, %c0_4] : memref<1x128xf32, #tpu.memory_space<vmem>>, vector<1x128xf32>
    %5 = vector.broadcast %4 : vector<1x128xf32> to vector<8x128xf32>
    %6 = arith.addf %3, %5 : vector<8x128xf32>
    %cst_5 = arith.constant 0.000000e+00 : f32
    %7 = vector.broadcast %cst_5 : f32 to vector<8x128xf32>
    %8 = arith.maximumf %6, %7 : vector<8x128xf32>
    %9 = arith.truncf %8 : vector<8x128xf32> to vector<8x128xbf16>
    %c0_6 = arith.constant 0 : index
    %c0_7 = arith.constant 0 : index
    %10 = vector.load %arg4[%c0_6, %c0_7] : memref<128x128xbf16, #tpu.memory_space<vmem>>, vector<128x128xbf16>
    %cst_8 = arith.constant dense<0.000000e+00> : vector<8x128xf32>
    %11 = tpu.matmul %9, %10, %cst_8 {dimension_numbers = #tpu.dot_dimension_numbers<[1], [0], [0], [1], [0, 0, 1, 1], [], []>} : vector<8x128xbf16>, vector<128x128xbf16>, vector<8x128xf32> -> vector<8x128xf32>
    %c0_9 = arith.constant 0 : index
    %c0_10 = arith.constant 0 : index
    %12 = vector.load %arg5[%c0_9, %c0_10] : memref<1x128xf32, #tpu.memory_space<vmem>>, vector<1x128xf32>
    %13 = vector.broadcast %12 : vector<1x128xf32> to vector<8x128xf32>
    %14 = arith.addf %11, %13 : vector<8x128xf32>
    %15 = vector.extract_strided_slice %14 {offsets = [0, 0], sizes = [8, 16], strides = [1, 1]} : vector<8x128xf32> to vector<8x16xf32>
    %16 = vector.extract_strided_slice %14 {offsets = [0, 16], sizes = [8, 16], strides = [1, 1]} : vector<8x128xf32> to vector<8x16xf32>
    %17 = arith.mulf %15, %16 : vector<8x16xf32>
    %cst_11 = arith.constant dense<0.000000e+00> : vector<8xf32>
    %18 = vector.multi_reduction <add>, %17, %cst_11 [1] : vector<8x16xf32> to vector<8xf32>
    %19 = vector.shape_cast %18 : vector<8xf32> to vector<8x1xf32>
    %cst_12 = arith.constant 0.000000e+00 : f32
    %20 = vector.broadcast %cst_12 : f32 to vector<8x1xf32>
    %21 = arith.subf %20, %19 : vector<8x1xf32>
    %22 = math.exp %21 : vector<8x1xf32>
    %cst_13 = arith.constant 1.000000e+00 : f32
    %23 = vector.broadcast %cst_13 : f32 to vector<8x1xf32>
    %24 = arith.addf %23, %22 : vector<8x1xf32>
    %cst_14 = arith.constant 1.000000e+00 : f32
    %25 = vector.broadcast %cst_14 : f32 to vector<8x1xf32>
    %26 = arith.divf %25, %24 : vector<8x1xf32>
    %c0_15 = arith.constant 0 : index
    %c0_16 = arith.constant 0 : index
    %27 = vector.load %arg6[%c0_15, %c0_16] : memref<8x1xf32, #tpu.memory_space<vmem>>, vector<8x1xf32>
    tpu.vector_store %arg6[%c0_15, %c0_16], %26 {strides = array<i32>} : memref<8x1xf32, #tpu.memory_space<vmem>>, vector<8x1xf32>,
    return
  }
  func.func @transform_0(%arg0: i32) -> (i32, i32) {
    %c0_i32 = arith.constant 0 : i32
    %c0_i32_0 = arith.constant 0 : i32
    return %arg0, %c0_i32 : i32, i32
  }
  func.func @transform_1(%arg0: i32) -> (i32, i32) {
    %c0_i32 = arith.constant 0 : i32
    %c0_i32_0 = arith.constant 0 : i32
    %c0_i32_1 = arith.constant 0 : i32
    return %c0_i32, %c0_i32_0 : i32, i32
  }
  func.func @transform_2(%arg0: i32) -> (i32, i32) {
    %c0_i32 = arith.constant 0 : i32
    %c0_i32_0 = arith.constant 0 : i32
    %c0_i32_1 = arith.constant 0 : i32
    return %c0_i32, %c0_i32_0 : i32, i32
  }
  func.func @transform_3(%arg0: i32) -> (i32, i32) {
    %c0_i32 = arith.constant 0 : i32
    %c0_i32_0 = arith.constant 0 : i32
    %c0_i32_1 = arith.constant 0 : i32
    return %c0_i32, %c0_i32_0 : i32, i32
  }
  func.func @transform_4(%arg0: i32) -> (i32, i32) {
    %c0_i32 = arith.constant 0 : i32
    %c0_i32_0 = arith.constant 0 : i32
    %c0_i32_1 = arith.constant 0 : i32
    return %c0_i32, %c0_i32_0 : i32, i32
  }
  func.func @transform_5(%arg0: i32) -> (i32, i32) {
    %c0_i32 = arith.constant 0 : i32
    %c0_i32_0 = arith.constant 0 : i32
    return %arg0, %c0_i32 : i32, i32
  }
}

</mosaic_0001>

<bundles_post_ra>
// kernel: tpu_custom_call.1
= control target key start
LH: loop header
LB: loop body
LE: loop exit
PB: predicated region body
PF: predicated region fallthrough
CT: control target
= control target key end

     0   :  { %10 = vsyncpa [#allocation3], 0  ;;  %s499_s0 = inlined_call_operand.hbm [shape: f32[8,32], index: 0, kind: input, shape index: {}]   ;;  %s500_s1 = inlined_call_operand.hbm [shape: bf16[32,128], index: 1, kind: input, shape index: {}]   ;;  %s501_s2 = inlined_call_operand.vmem [shape: f32[1,128], index: 2, kind: input, shape index: {}]   ;;  %s502_s3 = inlined_call_operand.hbm [shape: bf16[128,128], index: 3, kind: input, shape index: {}]   ;;  %s503_s4 = inlined_call_operand.vmem [shape: f32[1,128], index: 4, kind: input, shape index: {}]   ;;  %s504_s5 = inlined_call_operand.vmem [shape: f32[8,1], index: 5, kind: output, shape index: {}]  }
   0x1   :  { %11 = vsyncpa [#allocation5], 0  ;;  %s410_s18 = smov [#allocation4]   ;;  %s340_s22 = scalar_lea.hbm %s500_s1, 256 }
   0x2   :  { %s27_s19 = sshll.u32 %s410_s18, 4  ;;  %p341_p0 = scmp.ne.s32.totalorder %s500_s1, %s340_s22  ;;  %s28_s19 = int_to_ptr.vmem [resolvable:$true] %s27_s19 }
   0x3   :  { %p344_p1 = scmp.lt.u32.totalorder %s340_s22, %s500_s1 }
   0x5   :  { %p346_p2 = pnand %p344_p1, %p341_p0 }
   0x7   :  { %349 = shalt.err (!%p346_p2)
}
   0x8   :  { %s350_s27 = scalar_lea.vmem %s28_s19, 256  ;;  %p355_p4 = scmp.lt.s32.totalorder %s28_s19, %s28_s19 }
   0x9   :  { %p351_p3 = scmp.ne.s32.totalorder %s28_s19, %s350_s27  ;;  %p356_p5 = scmp.lt.s32.totalorder %s350_s27, %s350_s27 }
   0xb   :  { %p357_p6 = por %p356_p5, %p355_p4 }
   0xd   :  { %p358_p7 = pnand %p357_p6, %p351_p3 }
   0xf   :  { %361 = shalt.err (!%p358_p7)
}
  0x10   :  { %s411_s28 = smov 64   ;;  %s412_s29 = smov 4  }
  0x11   :  { %33 = dma.hbm_to_vmem [thread:$0]  %s500_s1, 256, %s28_s19, [#allocation5], %s411_s28, %s411_s28, %s412_s29  }
  0x12   :  { %s413_s7 = smov [#allocation2]   ;;  %s414_s9 = smov [#allocation6]  }
  0x13   :  { %s18_s8 = sshll.u32 %s413_s7, 4  ;;  %s41_s10 = sshll.u32 %s414_s9, 4  ;;  %s19_s8 = int_to_ptr.vmem [resolvable:$true] %s18_s8  ;;  %s42_s10 = int_to_ptr.vmem [resolvable:$true] %s41_s10 }
  0x14   :  { %s362_s13 = scalar_lea.hbm %s499_s0, 128 }
  0x15   :  { %p363_p8 = scmp.ne.s32.totalorder %s499_s0, %s362_s13  ;;  %p366_p9 = scmp.lt.u32.totalorder %s362_s13, %s499_s0 }
  0x17   :  { %p368_p10 = pnand %p366_p9, %p363_p8 }
  0x19   :  { %371 = shalt.err (!%p368_p10)
}
  0x1a   :  { %s372_s1 = scalar_lea.vmem %s19_s8, 128  ;;  %p377_p12 = scmp.lt.s32.totalorder %s19_s8, %s19_s8 }
  0x1b   :  { %p373_p11 = scmp.ne.s32.totalorder %s19_s8, %s372_s1  ;;  %p378_p13 = scmp.lt.s32.totalorder %s372_s1, %s372_s1 }
  0x1d   :  { %p379_p0 = por %p378_p13, %p377_p12 }
  0x1f   :  { %p380_p1 = pnand %p379_p0, %p373_p11 }
  0x21   :  { %383 = shalt.err (!%p380_p1)
}
  0x22   :  { %21 = dma.hbm_to_vmem [thread:$0]  %s499_s0, 128, %s19_s8, [#allocation3]  }
  0x23   :  { %s384_s22 = scalar_lea.hbm %s502_s3, 1024 }
  0x24   :  { %p385_p2 = scmp.ne.s32.totalorder %s502_s3, %s384_s22  ;;  %p388_p3 = scmp.lt.u32.totalorder %s384_s22, %s502_s3 }
  0x26   :  { %p390_p4 = pnand %p388_p3, %p385_p2 }
  0x28   :  { %393 = shalt.err (!%p390_p4)
}
  0x29   :  { %s394_s27 = scalar_lea.vmem %s42_s10, 1024  ;;  %p399_p6 = scmp.lt.s32.totalorder %s42_s10, %s42_s10 }
  0x2a   :  { %p395_p5 = scmp.ne.s32.totalorder %s42_s10, %s394_s27  ;;  %p400_p7 = scmp.lt.s32.totalorder %s394_s27, %s394_s27 }
  0x2c   :  { %p401_p8 = por %p400_p7, %p399_p6 }
  0x2e   :  { %p402_p9 = pnand %p401_p8, %p395_p5 }
  0x30   :  { %405 = shalt.err (!%p402_p9)
}
  0x31   :  { %47 = dma.hbm_to_vmem [thread:$0]  %s502_s3, 1024, %s42_s10, [#allocation5], %s411_s28, %s411_s28, %s412_s29  }
  0x32   :  { %406 = dma.done.wait [#allocation3], 128  }
  0x33   :  { %407 = vsyncadd [#allocation3], 4294967168 }
  0x34   :  { %408 = dma.done.wait [#allocation5], 1280  }
  0x35   :  { %409 = vsyncadd [#allocation5], 4294966016  ;;  %v415_v0 = vmov 0.0   ;;  %vm416_vm0 = vmmov 0   ;;  %v326_v1 = vld [vmem:[#allocation4] sm:$0xff]   ;;  %v327_v2 = vld [vmem:[#allocation4 + $0x8] sm:$0xff]  }
  0x36   :  { %290 = vmatprep.subr.bf16.mxu0 %v415_v0  ;;  %294 = vmatprep.mubr.msk.bf16.mxu0 %vm416_vm0, %v415_v0  ;;  %v60_v3 = vld [vmem:[#allocation2] sm:$0xff]  ;;  %v328_v4 = vld [vmem:[#allocation6] sm:$0xff]   ;;  %vm85_vm1 = vcmask 261120   ;;  %v330_v7 = vld [vmem:[#allocation6 + $0x10] sm:$0xff]   ;;  %s417_s7 = smov 112   ;;  %vm247_vm2 = vcmask 130048  }
  0x37   :  { %298 = vmatprep.subr.bf16.mxu1 %v415_v0  ;;  %314 = vmatprep.mubr.msk.bf16.mxu1 %vm416_vm0, %v415_v0  ;;  %v61_v5 = vpack.c.bf16 %v60_v3, %v60_v3  ;;  %v329_v6 = vld [vmem:[#allocation6 + $0x8] sm:$0xff]   ;;  %v331_v8 = vld [vmem:[#allocation6 + $0x18] sm:$0xff]   ;;  %v332_v9 = vld [vmem:[#allocation6 + $0x20] sm:$0xff]   ;;  %vm257_vm3 = vcmask 7168  }
  0x38   :  { %291 = vmatpush3.bf16.msra.mxu0 %v326_v1  ;;  %299 = vmatpush3.bf16.msra.mxu1 %v328_v4  ;;  %v333_v10 = vld [vmem:[#allocation6 + $0x28] sm:$0xff]   ;;  %v334_v11 = vld [vmem:[#allocation6 + $0x30] sm:$0xff]   ;;  %v335_v12 = vld [vmem:[#allocation6 + $0x38] sm:$0xff]  }
  0x39   :  { %292 = vmatprep.subr.bf16.mxu0 %v415_v0  ;;  %300 = vmatprep.subr.bf16.mxu1 %v415_v0  ;;  %v265_v13 = vld [vmem:[%s501_s2] ss:$0 sm:$0xff] }
  0x3a   :  { %v269_v21 = vld [vmem:[%s503_s4] ss:$0 sm:$0xff] }
  0x3c   :  { %293 = vmatpush3.bf16.msra.mxu0 %v327_v2  ;;  %301 = vmatpush3.bf16.msra.mxu1 %v329_v6 }
  0x3d   :  { %302 = vmatprep.subr.bf16.mxu1 %v415_v0 }
  0x3f   :  { %295 = vmatmul.mubr.msk.bf16.vlgmr.msra.gmra.mrb[0].mxu0 %vm85_vm1, %v61_v5 }
  0x40   :  { %303 = vmatpush3.bf16.msra.mxu1 %v330_v7 }
  0x41   :  { %304 = vmatprep.subr.bf16.mxu1 %v415_v0 }
  0x44   :  { %305 = vmatpush3.bf16.msra.mxu1 %v331_v8 }
  0x45   :  { %306 = vmatprep.subr.bf16.mxu1 %v415_v0 }
  0x48   :  { %307 = vmatpush3.bf16.msra.mxu1 %v332_v9 }
  0x49   :  { %308 = vmatprep.subr.bf16.mxu1 %v415_v0 }
  0x4c   :  { %309 = vmatpush3.bf16.msra.mxu1 %v333_v10 }
  0x4d   :  { %310 = vmatprep.subr.bf16.mxu1 %v415_v0 }
  0x50   :  { %311 = vmatpush3.bf16.msra.mxu1 %v334_v11 }
  0x51   :  { %312 = vmatprep.subr.bf16.mxu1 %v415_v0 }
  0x54   :  { %313 = vmatpush3.bf16.msra.mxu1 %v335_v12 }
 0x112   :  { %v123_v14 = vpop.f32.mrb[0].mxu0 }
 0x113   :  { %v124_v15 = vadd.f32 %v265_v13, %v123_v14  ;;  %v296_v16 = vpop.f32.mrb[1].mxu0 }
 0x114   :  { %v126_v17 = vpop.f32.mrb[2].mxu0 }
 0x115   :  { %v129_v18 = vmax.f32 %v124_v15, 0.0  ;;  %v297_v19 = vpop.f32.mrb[3].mxu0 }
 0x117   :  { %v130_v20 = vpack.c.bf16 %v129_v18, %v129_v18 }
 0x119   :  { %315 = vmatmul.mubr.bf16.vlgmr.msra.gmra.mrb[0].mxu1 %v130_v20 }
 0x1ec   :  { %v236_v22 = vpop.f32.mrb[0].mxu1 }
 0x1ed   :  { %v237_v23 = vadd.f32 %v269_v21, %v236_v22  ;;  %v316_v24 = vpop.f32.mrb[1].mxu1 }
 0x1ee   :  { %v239_v25 = vpop.f32.mrb[2].mxu1 }
 0x1ef   :  { %243 = vrot.lane.b32.xlu0 %v237_v23, %s417_s7  ;;  %v317_v26 = vpop.f32.mrb[3].mxu1 }
 0x261   :  { %v244_v27 = vpop.permute.xlu0 %243 }
 0x262   :  { %v246_v28 = vmul.f32 %v244_v27, %v237_v23 }
 0x264   :  { %v248_v29 = vsel %vm247_vm2, %v246_v28, 0.0 }
 0x265   :  { %249 = vadd.xlane.f32.xlu0 %v248_v29 }
 0x2f2   :  { %v250_v30 = vpop.xlane.xlu0 %249 }
 0x2f3   :  { %v251_v31 = vsub.f32 0.0, %v250_v30 }
 0x2f5   :  { %v252_v32 = vmul.f32 1.442695, %v251_v31 }
 0x2f7   :  { %336 = vpow2.f32 %v252_v32 }
 0x301   :  { %v337_v33 = vpop.eup %336 }
 0x302   :  { %v254_v34 = vadd.f32 1.0, %v337_v33 }
 0x304   :  { %338 = vrcp.f32 %v254_v34 }
 0x30e   :  { %v339_v35 = vpop.eup %338 }
 0x30f   :  { %258 = vst.msk [vmem:[%s504_s5] sm:$0xff] %vm257_vm3, %v339_v35 }
 0x310   :  { %263 = vsyncpa [#allocation3], 1 }
 0x311   :  { %264 = vsyncpa [#allocation5], 1 }

</bundles_post_ra>
